<compile_context>
chip_gen: v5e
topology: v5e:2x2
jax: 0.10.0
libtpu: 0.0.40
codegen_flags: <defaults>
</compile_context>

<pallas_src>
import math

import jax
import jax.numpy as jnp
import numpy as np
from jax import lax
from jax.experimental import pallas as pl
from jax.experimental.pallas import tpu as pltpu


def _conv_encoder_kernel(w_ref, x_ref, b_ref, o_ref):
    """Single im2col matmul + bias + LeakyReLU, transposed (lane-dense) output.

    w_ref: (E, Kc_pad)   conv weight, taps flattened (kh,kw,c), zero-padded to 128
    x_ref: (Kc_pad, N)   im2col patches, N = B*H*W  (lane-dense RHS)
    b_ref: (E, 1)        bias
    o_ref: (E, N)        pre-permute output (lane dim = N -> unmasked stores)
    """
    acc = jnp.dot(w_ref[...], x_ref[...], preferred_element_type=jnp.float32)
    acc = acc + b_ref[...]                               # (E,1) broadcast over lanes
    o_ref[...] = jnp.where(acc >= 0, acc, 0.01 * acc)    # LeakyReLU(0.01)


def conv_encoder_forward(x_nchw, weight_oihw, bias):
    """x_nchw: (B, C, H, W); weight_oihw: (E, C, K, K); bias: (E,).

    Returns (B, H*W, E) float32, matching ConvEncoder.forward semantics.
    """
    x_nchw = x_nchw.astype(jnp.float32)                  # input.type(torch.float32)
    B, C, H, W = x_nchw.shape
    E, _, K, _ = weight_oihw.shape
    pad = K // 2
    N = B * H * W
    Kc = K * K * C
    Kc_pad = ((Kc + 127) // 128) * 128                   # pad contraction to 128

    # ---- wrapper-side layout glue (XLA): im2col with lane-dense layouts ----
    x_nhwc = jnp.transpose(x_nchw, (0, 2, 3, 1))
    x_pad = jnp.pad(x_nhwc, ((0, 0), (pad, pad), (pad, pad), (0, 0)))
    # K*K shifted windows; tap order (kh, kw), channel innermost.
    windows = [x_pad[:, kh:kh + H, kw:kw + W, :]
               for kh in range(K) for kw in range(K)]    # each (B, H, W, C)
    patches = jnp.stack(windows, axis=3)                 # (B, H, W, K*K, C)
    slab = patches.reshape(N, Kc)                        # row = b*H*W + i*W + j
    slab = jnp.pad(slab, ((0, 0), (0, Kc_pad - Kc)))     # (N, Kc_pad)
    slab_t = jnp.transpose(slab, (1, 0))                 # (Kc_pad, N) lane-dense

    # OIHW -> (E, K, K, C) -> (E, K*K*C), matching the (kh, kw, c) tap order.
    w_t = jnp.transpose(weight_oihw.astype(jnp.float32), (0, 2, 3, 1)).reshape(E, Kc)
    w_t = jnp.pad(w_t, ((0, 0), (0, Kc_pad - Kc)))       # (E, Kc_pad)
    b2d = bias.astype(jnp.float32).reshape(E, 1)

    out_t = pl.pallas_call(
        _conv_encoder_kernel,
        out_shape=jax.ShapeDtypeStruct((E, N), jnp.float32),
        grid_spec=pltpu.PrefetchScalarGridSpec(
            num_scalar_prefetch=0,
            grid=(1,),                                   # whole batch in one step
            in_specs=[
                pl.BlockSpec((E, Kc_pad), lambda i: (0, 0)),
                pl.BlockSpec((Kc_pad, N), lambda i: (0, 0)),
                pl.BlockSpec((E, 1), lambda i: (0, 0)),
            ],
            out_specs=pl.BlockSpec((E, N), lambda i: (0, 0)),
        ),
        compiler_params=pltpu.CompilerParams(
            dimension_semantics=("arbitrary",),
        ),
    )(w_t, slab_t, b2d)

    # Final permute back to (B, H*W, E): torch flatten(-2,-1).permute(0,2,1).
    return jnp.transpose(out_t, (1, 0)).reshape(B, H * W, E)


def _reference(x_nchw, weight_oihw, bias):
    # Pure-JAX reference (XLA conv) for correctness checking.
    x = x_nchw.astype(jnp.float32)
    pad = weight_oihw.shape[-1] // 2
    y = lax.conv_general_dilated(
        x, weight_oihw.astype(jnp.float32),
        window_strides=(1, 1),
        padding=[(pad, pad), (pad, pad)],
        dimension_numbers=("NCHW", "OIHW", "NCHW"),
    ) + bias.astype(jnp.float32)[None, :, None, None]
    y = jnp.where(y >= 0, y, 0.01 * y)                   # LeakyReLU
    B, E, H, W = y.shape
    return jnp.transpose(y.reshape(B, E, H * W), (0, 2, 1))


if __name__ == "__main__":
    # Small shapes consistent with ConvEncoder: feature_size=4, embed_size=32,
    # kernel_size=5, spatial 16x16, batch 2.
    B, C, H, W = 2, 4, 16, 16
    E, K = 32, 5

    key = jax.random.PRNGKey(0)
    kx, kw = jax.random.split(key)

    x = jax.random.normal(kx, (B, C, H, W), dtype=jnp.float32)

    # Deterministic kaiming_normal_ (fan_in, leaky_relu, a=0 -> gain=sqrt(2)).
    fan_in = C * K * K
    std = math.sqrt(2.0) / math.sqrt(fan_in)
    weight = jax.random.normal(kw, (E, C, K, K), dtype=jnp.float32) * std
    bias = jnp.zeros((E,), jnp.float32)                  # nn.init.constant_(bias, 0)

    out = conv_encoder_forward(x, weight, bias)
    jax.block_until_ready(out)

    ref = _reference(x, weight, bias)
    assert out.shape == (B, H * W, E), out.shape
    np.testing.assert_allclose(np.asarray(out), np.asarray(ref),
                               rtol=1e-4, atol=1e-4)

    print("KERNEL_OK")
</pallas_src>

<mosaic_0001>
module attributes {stable_mosaic.version = 11 : i64} {
  func.func @_conv_encoder_kernel(%arg0: i32, %arg1: memref<32x128xf32, #tpu.memory_space<vmem>>, %arg2: memref<128x512xf32, #tpu.memory_space<vmem>>, %arg3: memref<32x1xf32, #tpu.memory_space<vmem>>, %arg4: memref<32x512xf32, #tpu.memory_space<vmem>>) attributes {dimension_semantics = [#tpu.dimension_semantics<arbitrary>], iteration_bounds = array<i64: 1>, scalar_prefetch = 0 : i64, scratch_operands = 0 : i64, tpu.core_type = #tpu.core_type<tc>, window_params = [{pipeline_mode = #tpu.pipeline_mode<synchronous>, transform_indices = @transform_0, window_bounds = array<i64: 32, 128>}, {pipeline_mode = #tpu.pipeline_mode<synchronous>, transform_indices = @transform_1, window_bounds = array<i64: 128, 512>}, {pipeline_mode = #tpu.pipeline_mode<synchronous>, transform_indices = @transform_2, window_bounds = array<i64: 32, 1>}, {pipeline_mode = #tpu.pipeline_mode<synchronous>, transform_indices = @transform_3, window_bounds = array<i64: 32, 512>}]} {
    %c0 = arith.constant 0 : index
    %c0_0 = arith.constant 0 : index
    %0 = vector.load %arg1[%c0, %c0_0] : memref<32x128xf32, #tpu.memory_space<vmem>>, vector<32x128xf32>
    %c0_1 = arith.constant 0 : index
    %c0_2 = arith.constant 0 : index
    %1 = vector.load %arg2[%c0_1, %c0_2] : memref<128x512xf32, #tpu.memory_space<vmem>>, vector<128x512xf32>
    %cst = arith.constant dense<0.000000e+00> : vector<32x512xf32>
    %2 = tpu.matmul %0, %1, %cst {dimension_numbers = #tpu.dot_dimension_numbers<[1], [0], [0], [1], [0, 0, 1, 1], [], []>} : vector<32x128xf32>, vector<128x512xf32>, vector<32x512xf32> -> vector<32x512xf32>
    %c0_3 = arith.constant 0 : index
    %c0_4 = arith.constant 0 : index
    %3 = vector.load %arg3[%c0_3, %c0_4] : memref<32x1xf32, #tpu.memory_space<vmem>>, vector<32x1xf32>
    %4 = vector.broadcast %3 : vector<32x1xf32> to vector<32x512xf32>
    %5 = arith.addf %2, %4 : vector<32x512xf32>
    %cst_5 = arith.constant 0.000000e+00 : f32
    %6 = vector.broadcast %cst_5 : f32 to vector<32x512xf32>
    %7 = arith.cmpf oge, %5, %6 : vector<32x512xf32>
    %cst_6 = arith.constant 0.00999999977 : f32
    %8 = vector.broadcast %cst_6 : f32 to vector<32x512xf32>
    %9 = arith.mulf %8, %5 : vector<32x512xf32>
    %10 = arith.select %7, %5, %9 : vector<32x512xi1>, vector<32x512xf32>
    %c0_7 = arith.constant 0 : index
    %c0_8 = arith.constant 0 : index
    %11 = vector.load %arg4[%c0_7, %c0_8] : memref<32x512xf32, #tpu.memory_space<vmem>>, vector<32x512xf32>
    tpu.vector_store %arg4[%c0_7, %c0_8], %10 {strides = array<i32>} : memref<32x512xf32, #tpu.memory_space<vmem>>, vector<32x512xf32>,
    return
  }
  func.func @transform_0(%arg0: i32) -> (i32, i32) {
    %c0_i32 = arith.constant 0 : i32
    %c0_i32_0 = arith.constant 0 : i32
    %c0_i32_1 = arith.constant 0 : i32
    return %c0_i32, %c0_i32_0 : i32, i32
  }
  func.func @transform_1(%arg0: i32) -> (i32, i32) {
    %c0_i32 = arith.constant 0 : i32
    %c0_i32_0 = arith.constant 0 : i32
    %c0_i32_1 = arith.constant 0 : i32
    return %c0_i32, %c0_i32_0 : i32, i32
  }
  func.func @transform_2(%arg0: i32) -> (i32, i32) {
    %c0_i32 = arith.constant 0 : i32
    %c0_i32_0 = arith.constant 0 : i32
    %c0_i32_1 = arith.constant 0 : i32
    return %c0_i32, %c0_i32_0 : i32, i32
  }
  func.func @transform_3(%arg0: i32) -> (i32, i32) {
    %c0_i32 = arith.constant 0 : i32
    %c0_i32_0 = arith.constant 0 : i32
    %c0_i32_1 = arith.constant 0 : i32
    return %c0_i32, %c0_i32_0 : i32, i32
  }
}

</mosaic_0001>

<bundles_post_ra>
// kernel: tpu_custom_call.1
= control target key start
LH: loop header
LB: loop body
LE: loop exit
PB: predicated region body
PF: predicated region fallthrough
CT: control target
= control target key end

     0   :  { %8 = vsyncpa [#allocation3], 0  ;;  %s442_s0 = inlined_call_operand.vmem [shape: f32[32,128], index: 0, kind: input, shape index: {}]   ;;  %s443_s1 = inlined_call_operand.hbm [shape: f32[128,512], index: 1, kind: input, shape index: {}]   ;;  %s444_s2 = inlined_call_operand.vmem [shape: f32[32,1], index: 2, kind: input, shape index: {}]   ;;  %s445_s3 = inlined_call_operand.hbm [shape: f32[32,512], index: 3, kind: output, shape index: {}]  }
   0x1   :  { %9 = vsyncpa [#allocation4], 0  ;;  %s16_s14 = sshll.u32 %s443_s1, 4  ;;  %s381_s15 = smov [#allocation2]   ;;  %s17_s14 = int_to_ptr.hbm [resolvable:$true] %s16_s14 }
   0x2   :  { %s18_s16 = sshll.u32 %s381_s15, 4  ;;  %s382_s17 = smov 512   ;;  %s19_s16 = int_to_ptr.vmem [resolvable:$true] %s18_s16 }
   0x3   :  { %s383_s18 = smov 32  }
   0x4   :  { %24 = dma.hbm_to_vmem [thread:$0]  %s17_s14, 8192, %s19_s16, [#allocation3], %s382_s17, %s382_s17, %s383_s18  }
   0x5   :  { %377 = dma.done.wait [#allocation3], 8192  }
   0x6   :  { %378 = vsyncadd [#allocation3], 4294959104  ;;  %v95_v0 = vld [vmem:[#allocation2 + $0x1e0] sm:$0xff]  ;;  %v96_v1 = vld [vmem:[#allocation2 + $0x1e8] sm:$0xff]  ;;  %s309_s9 = sshll.u32 %s445_s3, 4  ;;  %s310_s9 = int_to_ptr.hbm [resolvable:$true] %s309_s9 }
   0x7   :  { %v97_v2 = vld [vmem:[#allocation2 + $0x1f0] sm:$0xff]  ;;  %123 = vmatpush.msra.mxu0 %v95_v0  ;;  %152 = vmatpush.msra.mxu1 %v96_v1  ;;  %v98_v3 = vld [vmem:[#allocation2 + $0x1f8] sm:$0xff]  ;;  %v91_v4 = vld [vmem:[#allocation2 + $0x1c0] sm:$0xff] }
   0x8   :  { %v92_v5 = vld [vmem:[#allocation2 + $0x1c8] sm:$0xff]  ;;  %181 = vmatpush.msra.mxu2 %v97_v2  ;;  %210 = vmatpush.msra.mxu3 %v98_v3  ;;  %v93_v6 = vld [vmem:[#allocation2 + $0x1d0] sm:$0xff]  ;;  %v94_v7 = vld [vmem:[#allocation2 + $0x1d8] sm:$0xff]  ;;  %v384_v3 = vmov 0  }
   0x9   :  { %v87_v8 = vld [vmem:[#allocation2 + $0x1a0] sm:$0xff]  ;;  %124 = vmatpush.msra.mxu0 %v91_v4  ;;  %153 = vmatpush.msra.mxu1 %v92_v5  ;;  %v88_v9 = vld [vmem:[#allocation2 + $0x1a8] sm:$0xff]  ;;  %v89_v10 = vld [vmem:[#allocation2 + $0x1b0] sm:$0xff] }
   0xa   :  { %v90_v11 = vld [vmem:[#allocation2 + $0x1b8] sm:$0xff]  ;;  %182 = vmatpush.msra.mxu2 %v93_v6  ;;  %211 = vmatpush.msra.mxu3 %v94_v7  ;;  %v83_v12 = vld [vmem:[#allocation2 + $0x180] sm:$0xff]  ;;  %v84_v13 = vld [vmem:[#allocation2 + $0x188] sm:$0xff] }
   0xb   :  { %125 = vmatpush.msra.mxu0 %v87_v8  ;;  %154 = vmatpush.msra.mxu1 %v88_v9  ;;  %v85_v14 = vld [vmem:[#allocation2 + $0x190] sm:$0xff]  ;;  %v86_v15 = vld [vmem:[#allocation2 + $0x198] sm:$0xff]  ;;  %v79_v16 = vld [vmem:[#allocation2 + $0x160] sm:$0xff] }
   0xc   :  { %183 = vmatpush.msra.mxu2 %v89_v10  ;;  %212 = vmatpush.msra.mxu3 %v90_v11  ;;  %v80_v17 = vld [vmem:[#allocation2 + $0x168] sm:$0xff]  ;;  %v81_v18 = vld [vmem:[#allocation2 + $0x170] sm:$0xff]  ;;  %v82_v19 = vld [vmem:[#allocation2 + $0x178] sm:$0xff] }
   0xd   :  { %126 = vmatpush.msra.mxu0 %v83_v12  ;;  %155 = vmatpush.msra.mxu1 %v84_v13  ;;  %v75_v20 = vld [vmem:[#allocation2 + $0x140] sm:$0xff]  ;;  %v76_v21 = vld [vmem:[#allocation2 + $0x148] sm:$0xff]  ;;  %v77_v22 = vld [vmem:[#allocation2 + $0x150] sm:$0xff] }
   0xe   :  { %184 = vmatpush.msra.mxu2 %v85_v14  ;;  %213 = vmatpush.msra.mxu3 %v86_v15  ;;  %v78_v23 = vld [vmem:[#allocation2 + $0x158] sm:$0xff]  ;;  %v71_v24 = vld [vmem:[#allocation2 + $0x120] sm:$0xff]  ;;  %v72_v25 = vld [vmem:[#allocation2 + $0x128] sm:$0xff] }
   0xf   :  { %127 = vmatpush.msra.mxu0 %v79_v16  ;;  %156 = vmatpush.msra.mxu1 %v80_v17  ;;  %v73_v26 = vld [vmem:[#allocation2 + $0x130] sm:$0xff]  ;;  %v74_v27 = vld [vmem:[#allocation2 + $0x138] sm:$0xff]  ;;  %v67_v28 = vld [vmem:[#allocation2 + $0x100] sm:$0xff] }
  0x10   :  { %185 = vmatpush.msra.mxu2 %v81_v18  ;;  %214 = vmatpush.msra.mxu3 %v82_v19  ;;  %v68_v29 = vld [vmem:[#allocation2 + $0x108] sm:$0xff]  ;;  %v69_v30 = vld [vmem:[#allocation2 + $0x110] sm:$0xff]  ;;  %v70_v31 = vld [vmem:[#allocation2 + $0x118] sm:$0xff] }
  0x11   :  { %128 = vmatpush.msra.mxu0 %v75_v20  ;;  %157 = vmatpush.msra.mxu1 %v76_v21  ;;  %v63_v32 = vld [vmem:[#allocation2 + $0xe0] sm:$0xff]  ;;  %v64_v33 = vld [vmem:[#allocation2 + $0xe8] sm:$0xff]  ;;  %v65_v34 = vld [vmem:[#allocation2 + $0xf0] sm:$0xff] }
  0x12   :  { %186 = vmatpush.msra.mxu2 %v77_v22  ;;  %215 = vmatpush.msra.mxu3 %v78_v23  ;;  %v66_v35 = vld [vmem:[#allocation2 + $0xf8] sm:$0xff]  ;;  %v59_v36 = vld [vmem:[#allocation2 + $0xc0] sm:$0xff]  ;;  %v60_v37 = vld [vmem:[#allocation2 + $0xc8] sm:$0xff] }
  0x13   :  { %129 = vmatpush.msra.mxu0 %v71_v24  ;;  %158 = vmatpush.msra.mxu1 %v72_v25  ;;  %v61_v38 = vld [vmem:[#allocation2 + $0xd0] sm:$0xff]  ;;  %v62_v39 = vld [vmem:[#allocation2 + $0xd8] sm:$0xff]  ;;  %v55_v40 = vld [vmem:[#allocation2 + $0xa0] sm:$0xff] }
  0x14   :  { %187 = vmatpush.msra.mxu2 %v73_v26  ;;  %216 = vmatpush.msra.mxu3 %v74_v27  ;;  %v56_v41 = vld [vmem:[#allocation2 + $0xa8] sm:$0xff]  ;;  %v57_v42 = vld [vmem:[#allocation2 + $0xb0] sm:$0xff]  ;;  %v58_v43 = vld [vmem:[#allocation2 + $0xb8] sm:$0xff] }
  0x15   :  { %130 = vmatpush.msra.mxu0 %v67_v28  ;;  %159 = vmatpush.msra.mxu1 %v68_v29  ;;  %v51_v44 = vld [vmem:[#allocation2 + $0x80] sm:$0xff]  ;;  %v52_v45 = vld [vmem:[#allocation2 + $0x88] sm:$0xff]  ;;  %v53_v46 = vld [vmem:[#allocation2 + $0x90] sm:$0xff] }
  0x16   :  { %188 = vmatpush.msra.mxu2 %v69_v30  ;;  %217 = vmatpush.msra.mxu3 %v70_v31  ;;  %v54_v47 = vld [vmem:[#allocation2 + $0x98] sm:$0xff]  ;;  %v47_v48 = vld [vmem:[#allocation2 + $0x60] sm:$0xff]  ;;  %v48_v49 = vld [vmem:[#allocation2 + $0x68] sm:$0xff] }
  0x17   :  { %131 = vmatpush.msra.mxu0 %v63_v32  ;;  %160 = vmatpush.msra.mxu1 %v64_v33  ;;  %v49_v50 = vld [vmem:[#allocation2 + $0x70] sm:$0xff]  ;;  %v50_v51 = vld [vmem:[#allocation2 + $0x78] sm:$0xff]  ;;  %v43_v52 = vld [vmem:[#allocation2 + $0x40] sm:$0xff] }
  0x18   :  { %189 = vmatpush.msra.mxu2 %v65_v34  ;;  %218 = vmatpush.msra.mxu3 %v66_v35  ;;  %v44_v53 = vld [vmem:[#allocation2 + $0x48] sm:$0xff]  ;;  %v45_v54 = vld [vmem:[#allocation2 + $0x50] sm:$0xff]  ;;  %v46_v55 = vld [vmem:[#allocation2 + $0x58] sm:$0xff] }
  0x19   :  { %132 = vmatpush.msra.mxu0 %v59_v36  ;;  %161 = vmatpush.msra.mxu1 %v60_v37  ;;  %v39_v56 = vld [vmem:[#allocation2 + $0x20] sm:$0xff]  ;;  %v40_v57 = vld [vmem:[#allocation2 + $0x28] sm:$0xff]  ;;  %v41_v58 = vld [vmem:[#allocation2 + $0x30] sm:$0xff] }
  0x1a   :  { %190 = vmatpush.msra.mxu2 %v61_v38  ;;  %219 = vmatpush.msra.mxu3 %v62_v39  ;;  %v42_v59 = vld [vmem:[#allocation2 + $0x38] sm:$0xff]  ;;  %v35_v60 = vld [vmem:[#allocation2] sm:$0xff]  ;;  %v36_v61 = vld [vmem:[#allocation2 + $0x8] sm:$0xff] }
  0x1b   :  { %133 = vmatpush.msra.mxu0 %v55_v40  ;;  %162 = vmatpush.msra.mxu1 %v56_v41  ;;  %v37_v62 = vld [vmem:[#allocation2 + $0x10] sm:$0xff]  ;;  %v38_v63 = vld [vmem:[#allocation2 + $0x18] sm:$0xff]  ;;  %v31_v0 = vld [vmem:[%s442_s0] sm:$0xff] }
  0x1c   :  { %191 = vmatpush.msra.mxu2 %v57_v42  ;;  %220 = vmatpush.msra.mxu3 %v58_v43  ;;  %v99_v1 = vld [vmem:[%s444_s2] sm:$0xff]  ;;  %v101_v2 = vld [vmem:[%s444_s2 + $0x10] sm:$0xff]  ;;  %v32_v4 = vld [vmem:[%s442_s0 + $0x8] sm:$0xff] }
  0x1d   :  { %134 = vmatpush.msra.mxu0 %v51_v44  ;;  %163 = vmatpush.msra.mxu1 %v52_v45  ;;  %v100_v5 = vld [vmem:[%s444_s2 + $0x8] sm:$0xff]  ;;  %v102_v6 = vld [vmem:[%s444_s2 + $0x18] sm:$0xff]  ;;  %v33_v7 = vld [vmem:[%s442_s0 + $0x10] sm:$0xff] }
  0x1e   :  { %192 = vmatpush.msra.mxu2 %v53_v46  ;;  %221 = vmatpush.msra.mxu3 %v54_v47  ;;  %v34_v8 = vld [vmem:[%s442_s0 + $0x18] sm:$0xff]  ;;  %s385_s0 = smov [#allocation5]  }
  0x1f   :  { %135 = vmatpush.msra.mxu0 %v47_v48  ;;  %164 = vmatpush.msra.mxu1 %v48_v49  ;;  %s307_s2 = sshll.u32 %s385_s0, 4  ;;  %s308_s2 = int_to_ptr.vmem [resolvable:$true] %s307_s2 }
  0x20   :  { %193 = vmatpush.msra.mxu2 %v49_v50  ;;  %222 = vmatpush.msra.mxu3 %v50_v51 }
  0x21   :  { %136 = vmatpush.msra.mxu0 %v43_v52  ;;  %165 = vmatpush.msra.mxu1 %v44_v53 }
  0x22   :  { %194 = vmatpush.msra.mxu2 %v45_v54  ;;  %223 = vmatpush.msra.mxu3 %v46_v55 }
  0x23   :  { %137 = vmatpush.msra.mxu0 %v39_v56  ;;  %166 = vmatpush.msra.mxu1 %v40_v57 }
  0x24   :  { %195 = vmatpush.msra.mxu2 %v41_v58  ;;  %224 = vmatpush.msra.mxu3 %v42_v59 }
  0x25   :  { %138 = vmatpush.msra.mxu0 %v35_v60  ;;  %167 = vmatpush.msra.mxu1 %v36_v61 }
  0x26   :  { %196 = vmatpush.msra.mxu2 %v37_v62  ;;  %225 = vmatpush.msra.mxu3 %v38_v63 }
  0x27   :  { %139 = vmatmul.f32.vlgmr.msra.gmra.mxu0 %v31_v0  ;;  %168 = vmatmul.f32.vlgmr.msra.gmra.mxu1 %v31_v0 }
  0x28   :  { %197 = vmatmul.f32.vlgmr.msra.gmra.mxu2 %v31_v0  ;;  %226 = vmatmul.f32.vlgmr.msra.gmra.mxu3 %v31_v0 }
  0x29   :  { %327 = vset.pattern.permute.xlu0 %v384_v3  ;;  %328 = vset.pattern.permute.xlu1 %v384_v3 }
  0x2a   :  { %105 = vperm.xlu0 %327, %v99_v1   ;;  %115 = vperm.xlu1 %328, %v101_v2  }
  0x2f   :  { %142 = vmatmul.f32.gmra.mxu0 %v32_v4  ;;  %171 = vmatmul.f32.gmra.mxu1 %v32_v4 }
  0x30   :  { %200 = vmatmul.f32.gmra.mxu2 %v32_v4  ;;  %229 = vmatmul.f32.gmra.mxu3 %v32_v4 }
  0x32   :  { %110 = vperm.xlu0 %327, %v100_v5   ;;  %120 = vperm.xlu1 %328, %v102_v6  }
  0x37   :  { %145 = vmatmul.f32.gmra.mxu0 %v33_v7  ;;  %174 = vmatmul.f32.gmra.mxu1 %v33_v7 }
  0x38   :  { %203 = vmatmul.f32.gmra.mxu2 %v33_v7  ;;  %232 = vmatmul.f32.gmra.mxu3 %v33_v7 }
  0x3f   :  { %148 = vmatmul.f32.gmra.mxu0 %v34_v8  ;;  %177 = vmatmul.f32.gmra.mxu1 %v34_v8 }
  0x40   :  { %206 = vmatmul.f32.gmra.mxu2 %v34_v8  ;;  %235 = vmatmul.f32.gmra.mxu3 %v34_v8 }
  0x9c   :  { %v106_v9 = vpop.permute.xlu0 %105  ;;  %v116_v33 = vpop.permute.xlu1 %115 }
  0xa4   :  { %v140_v10 = vpop.f32.mrf.mxu0  ;;  %v169_v11 = vpop.f32.mrf.mxu1 }
  0xa5   :  { %v141_v12 = vadd.f32 %v140_v10, %v106_v9  ;;  %v170_v13 = vadd.f32 %v169_v11, %v106_v9  ;;  %v111_v18 = vpop.permute.xlu0 %110  ;;  %v121_v52 = vpop.permute.xlu1 %120 }
  0xa7   :  { %vm239_vm0 = vcmp.ge.f32.partialorder %v141_v12, 0.0  ;;  %vm240_vm1 = vcmp.ge.f32.partialorder %v170_v13, 0.0  ;;  %v255_v14 = vmul.f32 0.01, %v141_v12  ;;  %v256_v15 = vmul.f32 0.01, %v170_v13 }
  0xa9   :  { %v271_v16 = vsel %vm239_vm0, %v141_v12, %v255_v14  ;;  %v272_v17 = vsel %vm240_vm1, %v170_v13, %v256_v15 }
  0xaa   :  { %287 = vst [vmem:[#allocation5] sm:$0xff] %v271_v16 }
  0xab   :  { %288 = vst [vmem:[#allocation5 + $0x8] sm:$0xff] %v272_v17  ;;  %v198_v19 = vpop.f32.mrf.mxu2  ;;  %v227_v20 = vpop.f32.mrf.mxu3 }
  0xac   :  { %v199_v21 = vadd.f32 %v198_v19, %v106_v9  ;;  %v228_v22 = vadd.f32 %v227_v20, %v106_v9  ;;  %v143_v23 = vpop.f32.mrf.mxu0  ;;  %v172_v24 = vpop.f32.mrf.mxu1 }
  0xad   :  { %v144_v25 = vadd.f32 %v143_v23, %v111_v18  ;;  %v173_v26 = vadd.f32 %v172_v24, %v111_v18 }
  0xae   :  { %vm241_vm2 = vcmp.ge.f32.partialorder %v199_v21, 0.0  ;;  %v257_v27 = vmul.f32 0.01, %v199_v21  ;;  %vm242_vm3 = vcmp.ge.f32.partialorder %v228_v22, 0.0  ;;  %v258_v28 = vmul.f32 0.01, %v228_v22 }
  0xaf   :  { %vm243_vm4 = vcmp.ge.f32.partialorder %v144_v25, 0.0  ;;  %vm244_vm5 = vcmp.ge.f32.partialorder %v173_v26, 0.0  ;;  %v259_v29 = vmul.f32 0.01, %v144_v25  ;;  %v260_v30 = vmul.f32 0.01, %v173_v26 }
  0xb0   :  { %v273_v31 = vsel %vm241_vm2, %v199_v21, %v257_v27  ;;  %v274_v32 = vsel %vm242_vm3, %v228_v22, %v258_v28 }
  0xb1   :  { %289 = vst [vmem:[#allocation5 + $0x10] sm:$0xff] %v273_v31  ;;  %v275_v34 = vsel %vm243_vm4, %v144_v25, %v259_v29  ;;  %v276_v35 = vsel %vm244_vm5, %v173_v26, %v260_v30 }
  0xb2   :  { %290 = vst [vmem:[#allocation5 + $0x18] sm:$0xff] %v274_v32 }
  0xb3   :  { %291 = vst [vmem:[#allocation5 + $0x20] sm:$0xff] %v275_v34  ;;  %v201_v36 = vpop.f32.mrf.mxu2  ;;  %v230_v37 = vpop.f32.mrf.mxu3 }
  0xb4   :  { %292 = vst [vmem:[#allocation5 + $0x28] sm:$0xff] %v276_v35  ;;  %v202_v38 = vadd.f32 %v201_v36, %v111_v18  ;;  %v231_v39 = vadd.f32 %v230_v37, %v111_v18  ;;  %v146_v40 = vpop.f32.mrf.mxu0  ;;  %v175_v41 = vpop.f32.mrf.mxu1 }
  0xb5   :  { %v147_v42 = vadd.f32 %v146_v40, %v116_v33  ;;  %v176_v43 = vadd.f32 %v175_v41, %v116_v33 }
  0xb6   :  { %vm245_vm6 = vcmp.ge.f32.partialorder %v202_v38, 0.0  ;;  %v261_v44 = vmul.f32 0.01, %v202_v38  ;;  %vm246_vm7 = vcmp.ge.f32.partialorder %v231_v39, 0.0  ;;  %v262_v45 = vmul.f32 0.01, %v231_v39 }
  0xb7   :  { %vm247_vm8 = vcmp.ge.f32.partialorder %v147_v42, 0.0  ;;  %v263_v46 = vmul.f32 0.01, %v147_v42  ;;  %vm248_vm9 = vcmp.ge.f32.partialorder %v176_v43, 0.0  ;;  %v264_v47 = vmul.f32 0.01, %v176_v43 }
  0xb8   :  { %v277_v48 = vsel %vm245_vm6, %v202_v38, %v261_v44  ;;  %v278_v49 = vsel %vm246_vm7, %v231_v39, %v262_v45 }
  0xb9   :  { %293 = vst [vmem:[#allocation5 + $0x30] sm:$0xff] %v277_v48  ;;  %v279_v50 = vsel %vm247_vm8, %v147_v42, %v263_v46  ;;  %v280_v51 = vsel %vm248_vm9, %v176_v43, %v264_v47 }
  0xba   :  { %294 = vst [vmem:[#allocation5 + $0x38] sm:$0xff] %v278_v49 }
  0xbb   :  { %295 = vst [vmem:[#allocation5 + $0x40] sm:$0xff] %v279_v50  ;;  %v204_v53 = vpop.f32.mrf.mxu2  ;;  %v233_v54 = vpop.f32.mrf.mxu3 }
  0xbc   :  { %296 = vst [vmem:[#allocation5 + $0x48] sm:$0xff] %v280_v51  ;;  %v205_v55 = vadd.f32 %v204_v53, %v116_v33  ;;  %v234_v56 = vadd.f32 %v233_v54, %v116_v33  ;;  %v149_v57 = vpop.f32.mrf.mxu0  ;;  %v178_v58 = vpop.f32.mrf.mxu1 }
  0xbd   :  { %v150_v59 = vadd.f32 %v149_v57, %v121_v52  ;;  %v179_v60 = vadd.f32 %v178_v58, %v121_v52 }
  0xbe   :  { %vm249_vm10 = vcmp.ge.f32.partialorder %v205_v55, 0.0  ;;  %v265_v61 = vmul.f32 0.01, %v205_v55  ;;  %vm250_vm11 = vcmp.ge.f32.partialorder %v234_v56, 0.0  ;;  %v266_v62 = vmul.f32 0.01, %v234_v56 }
  0xbf   :  { %vm251_vm12 = vcmp.ge.f32.partialorder %v150_v59, 0.0  ;;  %v267_v63 = vmul.f32 0.01, %v150_v59  ;;  %vm252_vm13 = vcmp.ge.f32.partialorder %v179_v60, 0.0  ;;  %v268_v0 = vmul.f32 0.01, %v179_v60 }
  0xc0   :  { %v281_v1 = vsel %vm249_vm10, %v205_v55, %v265_v61  ;;  %v282_v2 = vsel %vm250_vm11, %v234_v56, %v266_v62 }
  0xc1   :  { %297 = vst [vmem:[#allocation5 + $0x50] sm:$0xff] %v281_v1  ;;  %v283_v3 = vsel %vm251_vm12, %v150_v59, %v267_v63  ;;  %v284_v4 = vsel %vm252_vm13, %v179_v60, %v268_v0 }
  0xc2   :  { %298 = vst [vmem:[#allocation5 + $0x58] sm:$0xff] %v282_v2 }
  0xc3   :  { %299 = vst [vmem:[#allocation5 + $0x60] sm:$0xff] %v283_v3  ;;  %v207_v5 = vpop.f32.mrf.mxu2  ;;  %v236_v6 = vpop.f32.mrf.mxu3 }
  0xc4   :  { %300 = vst [vmem:[#allocation5 + $0x68] sm:$0xff] %v284_v4  ;;  %v208_v7 = vadd.f32 %v207_v5, %v121_v52  ;;  %v237_v8 = vadd.f32 %v236_v6, %v121_v52 }
  0xc6   :  { %vm253_vm14 = vcmp.ge.f32.partialorder %v208_v7, 0.0  ;;  %v269_v9 = vmul.f32 0.01, %v208_v7  ;;  %vm254_vm15 = vcmp.ge.f32.partialorder %v237_v8, 0.0  ;;  %v270_v10 = vmul.f32 0.01, %v237_v8 }
  0xc8   :  { %v285_v11 = vsel %vm253_vm14, %v208_v7, %v269_v9  ;;  %v286_v12 = vsel %vm254_vm15, %v237_v8, %v270_v10 }
  0xc9   :  { %301 = vst [vmem:[#allocation5 + $0x70] sm:$0xff] %v285_v11 }
  0xca   :  { %302 = vst [vmem:[#allocation5 + $0x78] sm:$0xff] %v286_v12 }
  0xcb   :  { %315 = dma.vmem_to_hbm [thread:$0]  %s308_s2, 2048, %s310_s9, [#allocation4], %s382_s17, %s382_s17, %s383_s18  }
  0xcc   :  { %379 = dma.done.wait [#allocation4], 2048  }
  0xcd   :  { %380 = vsyncadd [#allocation4], 4294965248 }
  0xce   :  { %320 = vsyncpa [#allocation3], 1 }
  0xcf   :  { %321 = vsyncpa [#allocation4], 1 }

</bundles_post_ra>
